<compile_context>
chip_gen: v7x
topology: tpu7x:2x2x1
jax: 0.10.0
libtpu: 0.0.40
codegen_flags: <defaults>
</compile_context>

<pallas_src>
import functools
import math

import jax
import jax.numpy as jnp
from jax.experimental import pallas as pl
from jax.experimental.pallas import tpu as pltpu


def arcloss_kernel(x_ref, w_ref, ws_ref, lab_ref, out_ref,
                   xs_sc, m_sc, l_sc, p_sc, *, num_classes):
    j = pl.program_id(1)                 # class-tile index (reduction axis)
    n_j = pl.num_programs(1)
    tile_c = w_ref.shape[0]              # static

    @pl.when(j == 0)
    def _init():
        x32 = x_ref[...].astype(jnp.float32)                        # (Bt, E)
        # 1 / max(||x||, eps), once per batch tile (EUP rsqrt).
        xs_sc[...] = jax.lax.rsqrt(
            jnp.maximum(jnp.sum(x32 * x32, axis=-1, keepdims=True), 1e-24))
        m_sc[...] = jnp.full_like(m_sc, -1e30)
        l_sc[...] = jnp.zeros_like(l_sc)
        p_sc[...] = jnp.zeros_like(p_sc)

    # Raw (un-normalized) matmul on the MXU, contracting the embedding dim of
    # both operands (trans_b); f32 accumulation, scaled by the folded norms.
    raw = jax.lax.dot_general(
        x_ref[...], w_ref[...],
        dimension_numbers=(((1,), (1,)), ((), ())),
        preferred_element_type=jnp.float32)                          # (Bt, Tc)
    cosine = raw * xs_sc[...] * ws_ref[...]

    # Global class ids of this tile; mask zero-padded tail columns (if any).
    cls = jax.lax.broadcasted_iota(jnp.int32, cosine.shape, 1) + j * tile_c
    if num_classes % tile_c != 0:
        cosine = jnp.where(cls < num_classes, cosine, jnp.float32(-1e30))

    # Logit of the true class (nonzero in exactly one tile per row).
    onehot = (cls == lab_ref[...]).astype(jnp.float32)
    p_sc[...] += jnp.sum(cosine * onehot, axis=-1, keepdims=True)

    # Online logsumexp over the class tiles (degenerates to a single pass when
    # n_j == 1).
    m_prev = m_sc[...]
    m_new = jnp.maximum(m_prev, jnp.max(cosine, axis=-1, keepdims=True))
    l_sc[...] = (l_sc[...] * jnp.exp(m_prev - m_new)
                 + jnp.sum(jnp.exp(cosine - m_new), axis=-1, keepdims=True))
    m_sc[...] = m_new

    @pl.when(j == n_j - 1)
    def _finalize():
        # Per-example cross entropy: logsumexp(cosine) - cosine[label].
        out_ref[...] = m_sc[...] + jnp.log(l_sc[...]) - p_sc[...]


def _vmem_capacity_bytes():
    try:
        info = pltpu.get_tpu_info()
        cap = getattr(info, "vmem_capacity_bytes", None)
        if cap:
            return int(cap)
    except Exception:
        pass
    return 64 * 1024 * 1024   # conservative fallback (v7x has the least VMEM)


def arc_loss(x, weight, label, *, compute_dtype=jnp.bfloat16):
    """x: (B, E) f32, weight: (C, E) f32, label: (B,) int -> scalar f32 loss."""
    B, E = x.shape
    C, E2 = weight.shape
    assert E == E2
    assert E % 128 == 0, "embedding dim must be lane-aligned"

    itemsize = jnp.dtype(compute_dtype).itemsize

    # ---- batch tiling -------------------------------------------------------
    # Fill the MXU rows (256 on v6e/v7x, 128 already fills v5e) and keep >= 2
    # batch tiles whenever B permits so the "parallel" axis shards across
    # v7x's two TensorCores.  W is streamed once per batch tile, so a large
    # b_tile is the main lever against HBM re-streaming.
    if B >= 16:
        b_tile = min(256, max(8, (B // 2) // 8 * 8))
    else:
        b_tile = 8
    n_btiles = pl.cdiv(B, b_tile)
    b_pad = n_btiles * b_tile

    # ---- class tiling (generation-aware VMEM budget) ------------------------
    vmem_cap = _vmem_capacity_bytes()
    # Keep double-buffered weight tiles + double-buffered x tiles within ~1/4
    # of physical VMEM (v7x: ~16 MiB, v5e/v6e: ~32 MiB), leaving headroom for
    # scratch, outputs and compiler temporaries.
    budget = max(2 * 1024 * 1024, vmem_cap // 4)
    max_tile_c = max(
        128,
        ((budget - 2 * b_tile * E * itemsize) // (2 * E * itemsize)) // 128 * 128)

    c_pad_single = pl.cdiv(C, 128) * 128
    if c_pad_single <= max_tile_c:
        tile_c = c_pad_single                       # single class tile
    else:
        tile_c = min(max_tile_c, 2048)
    n_ctiles = pl.cdiv(C, tile_c)
    c_pad = n_ctiles * tile_c

    # ---- one-time wrapper plumbing ------------------------------------------
    # Cast to bf16 (halves HBM weight traffic, 2x MXU throughput on v6e/v7x);
    # no transpose -- the kernel contracts last dims directly.
    w_b = weight.astype(compute_dtype)
    if c_pad != C:
        w_b = jnp.pad(w_b, ((0, c_pad - C), (0, 0)))
    # Per-class inverse norms hoisted out of the kernel, derived from the same
    # bf16 weights the MXU sees (keeps kernel == bf16-pipeline reference).
    w32 = w_b.astype(jnp.float32)
    ws = jax.lax.rsqrt(
        jnp.maximum(jnp.sum(w32 * w32, axis=-1), 1e-24)).reshape(1, c_pad)

    x_c = x.astype(compute_dtype)
    lab2 = label.astype(jnp.int32).reshape(B, 1)
    if b_pad != B:
        x_c = jnp.pad(x_c, ((0, b_pad - B), (0, 0)))
        lab2 = jnp.pad(lab2, ((0, b_pad - B), (0, 0)))

    # Explicit VMEM limit sized from actual need (capped below physical).
    vmem_need = (2 * tile_c * E * itemsize          # double-buffered W tiles
                 + 2 * b_tile * E * itemsize        # double-buffered x tiles
                 + 2 * tile_c * 4                   # ws tiles
                 + 16 * b_tile * 4)                 # out + scratch + slack
    vmem_limit = int(min(vmem_cap * 3 // 4, max(32 * 2 ** 20, 2 * vmem_need)))

    kernel = functools.partial(arcloss_kernel, num_classes=C)

    per_example = pl.pallas_call(
        kernel,
        out_shape=jax.ShapeDtypeStruct((b_pad, 1), jnp.float32),
        grid_spec=pltpu.PrefetchScalarGridSpec(
            num_scalar_prefetch=0,
            grid=(n_btiles, n_ctiles),
            in_specs=[
                pl.BlockSpec((b_tile, E), lambda i, j: (i, 0)),      # x (resident)
                pl.BlockSpec((tile_c, E), lambda i, j: (j, 0)),      # W class tiles
                pl.BlockSpec((1, tile_c), lambda i, j: (0, j)),      # 1/||w_c||
                pl.BlockSpec((b_tile, 1), lambda i, j: (i, 0)),      # labels
            ],
            out_specs=pl.BlockSpec((b_tile, 1), lambda i, j: (i, 0)),
            scratch_shapes=[pltpu.VMEM((b_tile, 1), jnp.float32)] * 4,
        ),
        compiler_params=pltpu.CompilerParams(
            dimension_semantics=("parallel", "arbitrary"),
            vmem_limit_bytes=vmem_limit,
        ),
        cost_estimate=pl.CostEstimate(
            flops=2 * b_pad * c_pad * E,
            transcendentals=b_pad * c_pad,
            bytes_accessed=(n_btiles * c_pad * E * itemsize     # W restreamed per batch tile
                            + b_pad * E * itemsize              # x
                            + c_pad * 4                         # ws
                            + 2 * b_pad * 4),                   # labels + out
        ),
    )(x_c, w_b, ws, lab2)

    # Mean reduction of F.cross_entropy (tiny, done in the wrapper so the
    # batch grid axis stays parallel); drop any padded batch rows.
    return jnp.mean(per_example[:B, 0])


def xavier_uniform(key, shape):
    # nn.init.xavier_uniform_ for a 2D (fan_out, fan_in) weight.
    fan_out, fan_in = shape
    bound = math.sqrt(6.0 / (fan_in + fan_out))
    return jax.random.uniform(key, shape, jnp.float32, minval=-bound, maxval=bound)


if __name__ == "__main__":
    emb_size = 128
    num_classes = 576
    batch = 8

    key = jax.random.PRNGKey(0)
    k_x, k_w, k_lab = jax.random.split(key, 3)

    x = jax.random.normal(k_x, (batch, emb_size), dtype=jnp.float32)
    weight = xavier_uniform(k_w, (num_classes, emb_size))
    label = jax.random.randint(k_lab, (batch,), 0, num_classes, dtype=jnp.int32)

    loss = arc_loss(x, weight, label)
    jax.block_until_ready(loss)

    # Reference 1: exact f32 PyTorch-equivalent math (loose tolerance, since
    # the kernel feeds bf16 inputs to the MXU per the perf review).
    xn = x / jnp.maximum(jnp.linalg.norm(x, axis=-1, keepdims=True), 1e-12)
    wn = weight / jnp.maximum(jnp.linalg.norm(weight, axis=-1, keepdims=True), 1e-12)
    cosine = xn @ wn.T
    lse = jax.scipy.special.logsumexp(cosine, axis=-1)
    ref_f32 = jnp.mean(lse - cosine[jnp.arange(batch), label])
    assert jnp.allclose(loss, ref_f32, atol=3e-2, rtol=1e-2), (loss, ref_f32)

    # Reference 2: same bf16-input / folded-scale pipeline in plain JAX
    # (tighter tolerance; differences are only accumulation order).
    xb = x.astype(jnp.bfloat16)
    wb = weight.astype(jnp.bfloat16)
    xs = jax.lax.rsqrt(jnp.maximum(
        jnp.sum(xb.astype(jnp.float32) ** 2, axis=-1, keepdims=True), 1e-24))
    ws = jax.lax.rsqrt(jnp.maximum(
        jnp.sum(wb.astype(jnp.float32) ** 2, axis=-1, keepdims=True), 1e-24))
    cos_b = jnp.dot(xb, wb.T, preferred_element_type=jnp.float32) * xs * ws.T
    lse_b = jax.scipy.special.logsumexp(cos_b, axis=-1)
    ref_bf16 = jnp.mean(lse_b - cos_b[jnp.arange(batch), label])
    assert jnp.allclose(loss, ref_bf16, atol=2e-3, rtol=2e-3), (loss, ref_bf16)

    print("KERNEL_OK")
</pallas_src>

<mosaic_0001>
module attributes {stable_mosaic.version = 11 : i64} {
  func.func @arcloss_kernel(%arg0: i32, %arg1: i32, %arg2: memref<8x128xbf16, #tpu.memory_space<vmem>>, %arg3: memref<640x128xbf16, #tpu.memory_space<vmem>>, %arg4: memref<1x640xf32, #tpu.memory_space<vmem>>, %arg5: memref<8x1xi32, #tpu.memory_space<vmem>>, %arg6: memref<8x1xf32, #tpu.memory_space<vmem>>, %arg7: memref<8x1xf32, #tpu.memory_space<vmem>>, %arg8: memref<8x1xf32, #tpu.memory_space<vmem>>, %arg9: memref<8x1xf32, #tpu.memory_space<vmem>>, %arg10: memref<8x1xf32, #tpu.memory_space<vmem>>) attributes {dimension_semantics = [#tpu.dimension_semantics<parallel>, #tpu.dimension_semantics<arbitrary>], iteration_bounds = array<i64: 1, 1>, scalar_prefetch = 0 : i64, scratch_operands = 4 : i64, tpu.core_type = #tpu.core_type<tc>, window_params = [{transform_indices = @transform_0, window_bounds = array<i64: 8, 128>}, {transform_indices = @transform_1, window_bounds = array<i64: 640, 128>}, {transform_indices = @transform_2, window_bounds = array<i64: 1, 640>}, {transform_indices = @transform_3, window_bounds = array<i64: 8, 1>}, {transform_indices = @transform_4, window_bounds = array<i64: 8, 1>}]} {
    %c0_i32 = arith.constant 0 : i32
    %0 = arith.cmpi eq, %arg1, %c0_i32 : i32
    %1 = arith.extui %0 : i1 to i32
    %c0_i32_0 = arith.constant 0 : i32
    %2 = arith.cmpi ne, %1, %c0_i32_0 : i32
    scf.if %2 {
      %c0_28 = arith.constant 0 : index
      %c0_29 = arith.constant 0 : index
      %50 = vector.load %arg2[%c0_28, %c0_29] : memref<8x128xbf16, #tpu.memory_space<vmem>>, vector<8x128xbf16>
      %51 = arith.extf %50 : vector<8x128xbf16> to vector<8x128xf32>
      %52 = arith.mulf %51, %51 : vector<8x128xf32>
      %cst_30 = arith.constant dense<0.000000e+00> : vector<8xf32>
      %53 = vector.multi_reduction <add>, %52, %cst_30 [1] : vector<8x128xf32> to vector<8xf32>
      %54 = vector.shape_cast %53 : vector<8xf32> to vector<8x1xf32>
      %cst_31 = arith.constant 1.000000e-24 : f32
      %55 = vector.broadcast %cst_31 : f32 to vector<8x1xf32>
      %56 = arith.maximumf %54, %55 : vector<8x1xf32>
      %57 = math.rsqrt %56 : vector<8x1xf32>
      %c0_32 = arith.constant 0 : index
      %c0_33 = arith.constant 0 : index
      %58 = vector.load %arg7[%c0_32, %c0_33] : memref<8x1xf32, #tpu.memory_space<vmem>>, vector<8x1xf32>
      tpu.vector_store %arg7[%c0_32, %c0_33], %57 {strides = array<i32>} : memref<8x1xf32, #tpu.memory_space<vmem>>, vector<8x1xf32>,
      %cst_34 = arith.constant -1.000000e+30 : f32
      %59 = vector.broadcast %cst_34 : f32 to vector<8x1xf32>
      %c0_35 = arith.constant 0 : index
      %c0_36 = arith.constant 0 : index
      %60 = vector.load %arg8[%c0_35, %c0_36] : memref<8x1xf32, #tpu.memory_space<vmem>>, vector<8x1xf32>
      tpu.vector_store %arg8[%c0_35, %c0_36], %59 {strides = array<i32>} : memref<8x1xf32, #tpu.memory_space<vmem>>, vector<8x1xf32>,
      %cst_37 = arith.constant 0.000000e+00 : f32
      %61 = vector.broadcast %cst_37 : f32 to vector<8x1xf32>
      %c0_38 = arith.constant 0 : index
      %c0_39 = arith.constant 0 : index
      %62 = vector.load %arg9[%c0_38, %c0_39] : memref<8x1xf32, #tpu.memory_space<vmem>>, vector<8x1xf32>
      tpu.vector_store %arg9[%c0_38, %c0_39], %61 {strides = array<i32>} : memref<8x1xf32, #tpu.memory_space<vmem>>, vector<8x1xf32>,
      %cst_40 = arith.constant 0.000000e+00 : f32
      %63 = vector.broadcast %cst_40 : f32 to vector<8x1xf32>
      %c0_41 = arith.constant 0 : index
      %c0_42 = arith.constant 0 : index
      %64 = vector.load %arg10[%c0_41, %c0_42] : memref<8x1xf32, #tpu.memory_space<vmem>>, vector<8x1xf32>
      tpu.vector_store %arg10[%c0_41, %c0_42], %63 {strides = array<i32>} : memref<8x1xf32, #tpu.memory_space<vmem>>, vector<8x1xf32>,
    } else {
    }
    %c0 = arith.constant 0 : index
    %c0_1 = arith.constant 0 : index
    %3 = vector.load %arg2[%c0, %c0_1] : memref<8x128xbf16, #tpu.memory_space<vmem>>, vector<8x128xbf16>
    %c0_2 = arith.constant 0 : index
    %c0_3 = arith.constant 0 : index
    %4 = vector.load %arg3[%c0_2, %c0_3] : memref<640x128xbf16, #tpu.memory_space<vmem>>, vector<640x128xbf16>
    %cst = arith.constant dense<0.000000e+00> : vector<8x640xf32>
    %5 = tpu.matmul %3, %4, %cst {dimension_numbers = #tpu.dot_dimension_numbers<[1], [1], [0], [0], [0, 0, 1, 0], [], []>} : vector<8x128xbf16>, vector<640x128xbf16>, vector<8x640xf32> -> vector<8x640xf32>
    %c0_4 = arith.constant 0 : index
    %c0_5 = arith.constant 0 : index
    %6 = vector.load %arg7[%c0_4, %c0_5] : memref<8x1xf32, #tpu.memory_space<vmem>>, vector<8x1xf32>
    %7 = vector.broadcast %6 : vector<8x1xf32> to vector<8x640xf32>
    %8 = arith.mulf %5, %7 : vector<8x640xf32>
    %c0_6 = arith.constant 0 : index
    %c0_7 = arith.constant 0 : index
    %9 = vector.load %arg4[%c0_6, %c0_7] : memref<1x640xf32, #tpu.memory_space<vmem>>, vector<1x640xf32>
    %10 = vector.broadcast %9 : vector<1x640xf32> to vector<8x640xf32>
    %11 = arith.mulf %8, %10 : vector<8x640xf32>
    %12 = tpu.iota {dimensions = array<i32: 1>} : vector<8x640xi32>
    %c640_i32 = arith.constant 640 : i32
    %13 = arith.muli %arg1, %c640_i32 : i32
    %14 = vector.broadcast %13 : i32 to vector<8x640xi32>
    %15 = arith.addi %12, %14 : vector<8x640xi32>
    %c576_i32 = arith.constant 576 : i32
    %16 = vector.broadcast %c576_i32 : i32 to vector<8x640xi32>
    %17 = arith.cmpi slt, %15, %16 : vector<8x640xi32>
    %cst_8 = arith.constant -1.000000e+30 : f32
    %18 = vector.broadcast %cst_8 : f32 to vector<8x640xf32>
    %19 = arith.select %17, %11, %18 : vector<8x640xi1>, vector<8x640xf32>
    %c0_9 = arith.constant 0 : index
    %c0_10 = arith.constant 0 : index
    %20 = vector.load %arg5[%c0_9, %c0_10] : memref<8x1xi32, #tpu.memory_space<vmem>>, vector<8x1xi32>
    %21 = vector.broadcast %20 : vector<8x1xi32> to vector<8x640xi32>
    %22 = arith.cmpi eq, %15, %21 : vector<8x640xi32>
    %23 = arith.extui %22 : vector<8x640xi1> to vector<8x640xi32>
    %24 = arith.sitofp %23 : vector<8x640xi32> to vector<8x640xf32>
    %c0_11 = arith.constant 0 : index
    %c0_12 = arith.constant 0 : index
    %25 = vector.load %arg10[%c0_11, %c0_12] : memref<8x1xf32, #tpu.memory_space<vmem>>, vector<8x1xf32>
    %26 = arith.mulf %19, %24 : vector<8x640xf32>
    %cst_13 = arith.constant dense<0.000000e+00> : vector<8xf32>
    %27 = vector.multi_reduction <add>, %26, %cst_13 [1] : vector<8x640xf32> to vector<8xf32>
    %28 = vector.shape_cast %27 : vector<8xf32> to vector<8x1xf32>
    %29 = arith.addf %25, %28 : vector<8x1xf32>
    %c0_14 = arith.constant 0 : index
    %c0_15 = arith.constant 0 : index
    %30 = vector.load %arg10[%c0_14, %c0_15] : memref<8x1xf32, #tpu.memory_space<vmem>>, vector<8x1xf32>
    tpu.vector_store %arg10[%c0_14, %c0_15], %29 {strides = array<i32>} : memref<8x1xf32, #tpu.memory_space<vmem>>, vector<8x1xf32>,
    %c0_16 = arith.constant 0 : index
    %c0_17 = arith.constant 0 : index
    %31 = vector.load %arg8[%c0_16, %c0_17] : memref<8x1xf32, #tpu.memory_space<vmem>>, vector<8x1xf32>
    %cst_18 = arith.constant dense<0xFF800000> : vector<8xf32>
    %32 = vector.multi_reduction <maximumf>, %19, %cst_18 [1] : vector<8x640xf32> to vector<8xf32>
    %33 = vector.shape_cast %32 : vector<8xf32> to vector<8x1xf32>
    %34 = arith.maximumf %31, %33 : vector<8x1xf32>
    %c0_19 = arith.constant 0 : index
    %c0_20 = arith.constant 0 : index
    %35 = vector.load %arg9[%c0_19, %c0_20] : memref<8x1xf32, #tpu.memory_space<vmem>>, vector<8x1xf32>
    %36 = arith.subf %31, %34 : vector<8x1xf32>
    %37 = math.exp %36 : vector<8x1xf32>
    %38 = arith.mulf %35, %37 : vector<8x1xf32>
    %39 = vector.broadcast %34 : vector<8x1xf32> to vector<8x640xf32>
    %40 = arith.subf %19, %39 : vector<8x640xf32>
    %41 = math.exp %40 : vector<8x640xf32>
    %cst_21 = arith.constant dense<0.000000e+00> : vector<8xf32>
    %42 = vector.multi_reduction <add>, %41, %cst_21 [1] : vector<8x640xf32> to vector<8xf32>
    %43 = vector.shape_cast %42 : vector<8xf32> to vector<8x1xf32>
    %44 = arith.addf %38, %43 : vector<8x1xf32>
    %c0_22 = arith.constant 0 : index
    %c0_23 = arith.constant 0 : index
    %45 = vector.load %arg9[%c0_22, %c0_23] : memref<8x1xf32, #tpu.memory_space<vmem>>, vector<8x1xf32>
    tpu.vector_store %arg9[%c0_22, %c0_23], %44 {strides = array<i32>} : memref<8x1xf32, #tpu.memory_space<vmem>>, vector<8x1xf32>,
    %c0_24 = arith.constant 0 : index
    %c0_25 = arith.constant 0 : index
    %46 = vector.load %arg8[%c0_24, %c0_25] : memref<8x1xf32, #tpu.memory_space<vmem>>, vector<8x1xf32>
    tpu.vector_store %arg8[%c0_24, %c0_25], %34 {strides = array<i32>} : memref<8x1xf32, #tpu.memory_space<vmem>>, vector<8x1xf32>,
    %c0_i32_26 = arith.constant 0 : i32
    %47 = arith.cmpi eq, %arg1, %c0_i32_26 : i32
    %48 = arith.extui %47 : i1 to i32
    %c0_i32_27 = arith.constant 0 : i32
    %49 = arith.cmpi ne, %48, %c0_i32_27 : i32
    scf.if %49 {
      %c0_28 = arith.constant 0 : index
      %c0_29 = arith.constant 0 : index
      %50 = vector.load %arg8[%c0_28, %c0_29] : memref<8x1xf32, #tpu.memory_space<vmem>>, vector<8x1xf32>
      %c0_30 = arith.constant 0 : index
      %c0_31 = arith.constant 0 : index
      %51 = vector.load %arg9[%c0_30, %c0_31] : memref<8x1xf32, #tpu.memory_space<vmem>>, vector<8x1xf32>
      %52 = math.log %51 : vector<8x1xf32>
      %53 = arith.addf %50, %52 : vector<8x1xf32>
      %c0_32 = arith.constant 0 : index
      %c0_33 = arith.constant 0 : index
      %54 = vector.load %arg10[%c0_32, %c0_33] : memref<8x1xf32, #tpu.memory_space<vmem>>, vector<8x1xf32>
      %55 = arith.subf %53, %54 : vector<8x1xf32>
      %c0_34 = arith.constant 0 : index
      %c0_35 = arith.constant 0 : index
      %56 = vector.load %arg6[%c0_34, %c0_35] : memref<8x1xf32, #tpu.memory_space<vmem>>, vector<8x1xf32>
      tpu.vector_store %arg6[%c0_34, %c0_35], %55 {strides = array<i32>} : memref<8x1xf32, #tpu.memory_space<vmem>>, vector<8x1xf32>,
    } else {
    }
    return
  }
  func.func @transform_0(%arg0: i32, %arg1: i32) -> (i32, i32) {
    %c0_i32 = arith.constant 0 : i32
    %c0_i32_0 = arith.constant 0 : i32
    return %arg0, %c0_i32 : i32, i32
  }
  func.func @transform_1(%arg0: i32, %arg1: i32) -> (i32, i32) {
    %c0_i32 = arith.constant 0 : i32
    %c0_i32_0 = arith.constant 0 : i32
    return %arg1, %c0_i32 : i32, i32
  }
  func.func @transform_2(%arg0: i32, %arg1: i32) -> (i32, i32) {
    %c0_i32 = arith.constant 0 : i32
    %c0_i32_0 = arith.constant 0 : i32
    return %c0_i32, %arg1 : i32, i32
  }
  func.func @transform_3(%arg0: i32, %arg1: i32) -> (i32, i32) {
    %c0_i32 = arith.constant 0 : i32
    %c0_i32_0 = arith.constant 0 : i32
    return %arg0, %c0_i32 : i32, i32
  }
  func.func @transform_4(%arg0: i32, %arg1: i32) -> (i32, i32) {
    %c0_i32 = arith.constant 0 : i32
    %c0_i32_0 = arith.constant 0 : i32
    return %arg0, %c0_i32 : i32, i32
  }
}

</mosaic_0001>

<bundles_post_ra>
// kernel: tpu_custom_call.1
= control target key start
LH: loop header
LB: loop body
LE: loop exit
PB: predicated region body
PF: predicated region fallthrough
CT: control target
= control target key end

     0   :  { %9 = vsyncpa [#allocation7], 0  ;;  %s848_s15 = smov [#allocation6]   ;;  %s949_s0 = inlined_call_operand.vmem [shape: bf16[8,128], index: 0, kind: input, shape index: {}]   ;;  %s950_s1 = inlined_call_operand.hbm [shape: bf16[640,128], index: 1, kind: input, shape index: {}]   ;;  %s951_s2 = inlined_call_operand.vmem [shape: f32[1,640], index: 2, kind: input, shape index: {}]   ;;  %s952_s3 = inlined_call_operand.vmem [shape: s32[8,1], index: 3, kind: input, shape index: {}]   ;;  %s953_s4 = inlined_call_operand.vmem [shape: f32[8,1], index: 4, kind: output, shape index: {}]  }
   0x1   :  { %s17_s16 = sshll.u32 %s848_s15, 4  ;;  %s824_s19 = scalar_lea.hbm %s950_s1, 5120  ;;  %s18_s16 = int_to_ptr.vmem [resolvable:$true] %s17_s16 }
   0x2   :  { %p825_p0 = scmp.ne.s32.totalorder %s950_s1, %s824_s19  ;;  %p828_p1 = scmp.lt.u32.totalorder %s824_s19, %s950_s1 }
   0x4   :  { %p830_p2 = pnand %p828_p1, %p825_p0 }
   0x6   :  { %833 = shalt.err (!%p830_p2)
}
   0x7   :  { %s834_s24 = scalar_lea.vmem %s18_s16, 5120  ;;  %p839_p4 = scmp.lt.s32.totalorder %s18_s16, %s18_s16 }
   0x8   :  { %p835_p3 = scmp.ne.s32.totalorder %s18_s16, %s834_s24  ;;  %p840_p5 = scmp.lt.s32.totalorder %s834_s24, %s834_s24 }
   0xa   :  { %p841_p6 = por %p840_p5, %p839_p4 }
   0xc   :  { %p842_p7 = pnand %p841_p6, %p835_p3 }
   0xe   :  { %845 = shalt.err (!%p842_p7)
}
   0xf   :  { %s849_s25 = smov 64   ;;  %s850_s26 = smov 4  }
  0x10   :  { %23 = dma.hbm_to_vmem [thread:$0]  %s950_s1, 5120, %s18_s16, [#allocation7], %s849_s25, %s849_s25, %s850_s26  }
  0x11   :  { %846 = dma.done.wait [#allocation7], 5120  }
  0x12   :  { %847 = vsyncadd [#allocation7], 4294962176  ;;  %v768_v0 = vld [vmem:[#allocation6 + $0x40] sm:$0xff]   ;;  %v770_v4 = vld [vmem:[#allocation6 + $0x48] sm:$0xff]   ;;  %vm43_vm0 = vcmask 7168   ;;  %v851_v5 = vmov 0.0   ;;  %v504_v59 = vlaneseq }
  0x13   :  { %v769_v1 = vld [vmem:[#allocation6] sm:$0xff]   ;;  %694 = vmatprep.subr.bf16.mxu0 %v768_v0  ;;  %46 = vst.msk [vmem:[#allocation4] sm:$0xff] %vm43_vm0, %v851_v5  ;;  %47 = vst.msk [vmem:[#allocation5] sm:$0xff] %vm43_vm0, %v851_v5  ;;  %v771_v7 = vld [vmem:[#allocation6 + $0x8] sm:$0xff]   ;;  %v852_v23 = vmov 0   ;;  %vm853_vm1 = vmmov 0  }
  0x14   :  { %v36_v2 = vld [vmem:[%s949_s0] sm:$0xf]  ;;  %695 = vmatpush3.bf16.xpose.msra.mxu0 %v769_v1  ;;  %v772_v8 = vld [vmem:[#allocation6 + $0x50] sm:$0xff]   ;;  %v774_v10 = vld [vmem:[#allocation6 + $0x58] sm:$0xff]   ;;  %766 = vset.pattern.permute.xlu0 %v852_v23  ;;  %v854_v50 = vmov -1e+30  }
  0x15   :  { %v37_v3 = vunpack.c.l.bf16 %v36_v2  ;;  %696 = vmatprep.subr.bf16.mxu0 %v770_v4  ;;  %v773_v9 = vld [vmem:[#allocation6 + $0x10] sm:$0xff]   ;;  %v902_v11 = vld [vmem:[%s949_s0] sm:$0xf]  ;;  %v787_v14 = vld [vmem:[#allocation6 + $0xc8] sm:$0xff]   ;;  %767 = vset.pattern.permute.xlu1 %v852_v23  ;;  %45 = vst.msk [vmem:[#allocation3] sm:$0xff] %vm43_vm0, %v854_v50  ;;  %v505_v60 = vshrl.u32 %v504_v59, 7 }
  0x16   :  { %710 = vmatprep.mubr.bf16.mxu0 %v902_v11  ;;  %v784_v12 = vld [vmem:[#allocation6 + $0xc0] sm:$0xff]   ;;  %728 = vmatprep.mubr.bf16.mxu1 %v902_v11  ;;  %v775_v15 = vld [vmem:[#allocation6 + $0x18] sm:$0xff]   ;;  %v788_v17 = vld [vmem:[#allocation6 + $0x88] sm:$0xff]   ;;  %v920_v61 = vand.u32 127, %v504_v59 }
  0x17   :  { %v38_v6 = vmul.f32 %v37_v3, %v37_v3  ;;  %v785_v13 = vld [vmem:[#allocation6 + $0x80] sm:$0xff]   ;;  %712 = vmatprep.subr.bf16.mxu1 %v784_v12  ;;  %v790_v18 = vld [vmem:[#allocation6 + $0xd0] sm:$0xff]   ;;  %v778_v20 = vld [vmem:[#allocation6 + $0x68] sm:$0xff]   ;;  %v514_v62 = vsub.s32 2, %v505_v60  ;;  %v522_v63 = vsub.s32 4, %v505_v60  ;;  %v506_v0 = vsub.s32 0, %v505_v60 }
  0x18   :  { %713 = vmatpush3.bf16.xpose.msra.mxu1 %v785_v13  ;;  %v776_v16 = vld [vmem:[#allocation6 + $0x60] sm:$0xff]   ;;  %v791_v21 = vld [vmem:[#allocation6 + $0x90] sm:$0xff]   ;;  %v793_v22 = vld [vmem:[#allocation6 + $0xd8] sm:$0xff]   ;;  %v518_v2 = vsub.s32 3, %v505_v60  ;;  %v926_v4 = vadd.s32 512, %v920_v61 }
  0x19   :  { %39 = vadd.xlane.f32.xlu0 %v38_v6  ;;  %714 = vmatprep.subr.bf16.mxu1 %v787_v14  ;;  %v777_v19 = vld [vmem:[#allocation6 + $0x20] sm:$0xff]   ;;  %v779_v24 = vld [vmem:[#allocation6 + $0x28] sm:$0xff]   ;;  %v780_v25 = vld [vmem:[#allocation6 + $0x70] sm:$0xff]   ;;  %v510_v6 = vsub.s32 1, %v505_v60 }
  0x1a   :  { %v794_v26 = vld [vmem:[#allocation6 + $0x98] sm:$0xff]   ;;  %v796_v27 = vld [vmem:[#allocation6 + $0xe0] sm:$0xff]   ;;  %v781_v28 = vld [vmem:[#allocation6 + $0x30] sm:$0xff]   ;;  %vm551_vm2 = vcmp.lt.s32.totalorder %v926_v4, 576 }
  0x1b   :  { %v782_v29 = vld [vmem:[#allocation6 + $0x78] sm:$0xff]   ;;  %v797_v30 = vld [vmem:[#allocation6 + $0xa0] sm:$0xff]   ;;  %v799_v31 = vld [vmem:[#allocation6 + $0xe8] sm:$0xff]  }
  0x1c   :  { %697 = vmatpush3.bf16.xpose.msra.mxu0 %v771_v7  ;;  %v783_v32 = vld [vmem:[#allocation6 + $0x38] sm:$0xff]   ;;  %v800_v33 = vld [vmem:[#allocation6 + $0xa8] sm:$0xff]   ;;  %v802_v34 = vld [vmem:[#allocation6 + $0xf0] sm:$0xff]  }
  0x1d   :  { %698 = vmatprep.subr.bf16.mxu0 %v772_v8  ;;  %v786_v35 = vld [vmem:[#allocation6 + $0x100] sm:$0xff]   ;;  %v803_v36 = vld [vmem:[#allocation6 + $0xb0] sm:$0xff]   ;;  %v805_v37 = vld [vmem:[#allocation6 + $0xf8] sm:$0xff]  }
  0x1e   :  { %v789_v38 = vld [vmem:[#allocation6 + $0x108] sm:$0xff]   ;;  %v806_v39 = vld [vmem:[#allocation6 + $0xb8] sm:$0xff]   ;;  %v792_v40 = vld [vmem:[#allocation6 + $0x110] sm:$0xff]  }
  0x1f   :  { %v795_v41 = vld [vmem:[#allocation6 + $0x118] sm:$0xff]   ;;  %v798_v42 = vld [vmem:[#allocation6 + $0x120] sm:$0xff]   ;;  %v801_v43 = vld [vmem:[#allocation6 + $0x128] sm:$0xff]  }
  0x20   :  { %715 = vmatpush3.bf16.xpose.msra.mxu1 %v788_v17  ;;  %v804_v44 = vld [vmem:[#allocation6 + $0x130] sm:$0xff]   ;;  %v807_v45 = vld [vmem:[#allocation6 + $0x138] sm:$0xff]   ;;  %v502_v1 = vld [vmem:[%s951_s2] sm:$0x1f] }
  0x21   :  { %716 = vmatprep.subr.bf16.mxu1 %v790_v18  ;;  %v515_v7 = vrot.slane %v502_v1, %v514_v62  ;;  %v523_v8 = vrot.slane %v502_v1, %v522_v63  ;;  %v519_v13 = vrot.slane %v502_v1, %v518_v2 }
  0x24   :  { %699 = vmatpush3.bf16.xpose.msra.mxu0 %v773_v9  ;;  %v507_v9 = vrot.slane %v502_v1, %v506_v0 }
  0x25   :  { %700 = vmatprep.subr.bf16.mxu0 %v774_v10 }
  0x28   :  { %717 = vmatpush3.bf16.xpose.msra.mxu1 %v791_v21 }
  0x29   :  { %718 = vmatprep.subr.bf16.mxu1 %v793_v22 }
  0x2c   :  { %701 = vmatpush3.bf16.xpose.msra.mxu0 %v775_v15 }
  0x2d   :  { %702 = vmatprep.subr.bf16.mxu0 %v776_v16 }
  0x30   :  { %719 = vmatpush3.bf16.xpose.msra.mxu1 %v794_v26 }
  0x31   :  { %720 = vmatprep.subr.bf16.mxu1 %v796_v27 }
  0x34   :  { %703 = vmatpush3.bf16.xpose.msra.mxu0 %v777_v19  ;;  %v511_v19 = vrot.slane %v502_v1, %v510_v6 }
  0x35   :  { %704 = vmatprep.subr.bf16.mxu0 %v778_v20 }
  0x38   :  { %721 = vmatpush3.bf16.xpose.msra.mxu1 %v797_v30 }
  0x39   :  { %722 = vmatprep.subr.bf16.mxu1 %v799_v31  ;;  %v591_v31 = vld [vmem:[#allocation3] sm:$0xff] }
  0x3c   :  { %705 = vmatpush3.bf16.xpose.msra.mxu0 %v779_v24 }
  0x3d   :  { %706 = vmatprep.subr.bf16.mxu0 %v780_v25 }
  0x40   :  { %723 = vmatpush3.bf16.xpose.msra.mxu1 %v800_v33 }
  0x41   :  { %724 = vmatprep.subr.bf16.mxu1 %v802_v34 }
  0x44   :  { %707 = vmatpush3.bf16.xpose.msra.mxu0 %v781_v28 }
  0x45   :  { %708 = vmatprep.subr.bf16.mxu0 %v782_v29 }
  0x48   :  { %725 = vmatpush3.bf16.xpose.msra.mxu1 %v803_v36 }
  0x49   :  { %726 = vmatprep.subr.bf16.mxu1 %v805_v37  ;;  %v536_v37 = vadd.s32 128, %v920_v61 }
  0x4c   :  { %709 = vmatpush3.bf16.xpose.msra.mxu0 %v783_v32 }
  0x4d   :  { %739 = vmatprep.subr.bf16.mxu0 %v851_v5 }
  0x50   :  { %727 = vmatpush3.bf16.xpose.msra.mxu1 %v806_v39 }
  0x53   :  { %711 = vmatmul.mubr.bf16.vlgmr.msra.gmra.mrb[0].mxu0 %v902_v11 }
  0x54   :  { %740 = vmatpush3.bf16.xpose.msra.mxu0 %v786_v35  ;;  %755 = vmatprep.mubr.msk.bf16.mxu0 %vm853_vm1, %v851_v5  ;;  %v557_v35 = vld [vmem:[%s952_s3] sm:$0xff] }
  0x55   :  { %741 = vmatprep.subr.bf16.mxu0 %v851_v5 }
  0x57   :  { %729 = vmatmul.mubr.bf16.vlgmr.msra.gmra.mrb[0].mxu1 %v902_v11 }
  0x5c   :  { %742 = vmatpush3.bf16.xpose.msra.mxu0 %v789_v38  ;;  %v537_v38 = vadd.s32 256, %v920_v61 }
  0x5d   :  { %743 = vmatprep.subr.bf16.mxu0 %v851_v5 }
  0x64   :  { %744 = vmatpush3.bf16.xpose.msra.mxu0 %v792_v40 }
  0x65   :  { %745 = vmatprep.subr.bf16.mxu0 %v851_v5 }
  0x6c   :  { %746 = vmatpush3.bf16.xpose.msra.mxu0 %v795_v41 }
  0x6d   :  { %747 = vmatprep.subr.bf16.mxu0 %v851_v5 }
  0x74   :  { %748 = vmatpush3.bf16.xpose.msra.mxu0 %v798_v42 }
  0x75   :  { %749 = vmatprep.subr.bf16.mxu0 %v851_v5 }
  0x7c   :  { %750 = vmatpush3.bf16.xpose.msra.mxu0 %v801_v43  ;;  %v538_v43 = vadd.s32 384, %v920_v61 }
  0x7d   :  { %751 = vmatprep.subr.bf16.mxu0 %v851_v5 }
  0x84   :  { %752 = vmatpush3.bf16.xpose.msra.mxu0 %v804_v44 }
  0x85   :  { %753 = vmatprep.subr.bf16.mxu0 %v851_v5 }
  0x8c   :  { %754 = vmatpush3.bf16.xpose.msra.mxu0 %v807_v45 }
  0x93   :  { %756 = vmatmul.mubr.bf16.vlgmr.msra.gmra.mrb[4].mxu0 %v902_v11 }
  0xa6   :  { %v40_v46 = vpop.xlane.xlu0 %39 }
  0xa7   :  { %v41_v47 = vmax.f32 %v40_v46, 1e-24 }
  0xa9   :  { %808 = vrsqrt.f32 %v41_v47 }
  0xb3   :  { %v809_v48 = vpop.eup %808 }
  0xb4   :  { %44 = vst.msk [vmem:[#allocation2] sm:$0xff] %vm43_vm0, %v809_v48 }
  0xbb   :  { %v491_v49 = vld [vmem:[#allocation2] sm:$0xff] }
  0xbc   :  { %494 = vperm.xlu0 %766, %v491_v49  }
 0x126   :  { %v403_v51 = vpop.f32.mrb[0].mxu0 }
 0x127   :  { %v405_v52 = vpop.f32.mrb[1].mxu0 }
 0x128   :  { %v407_v53 = vpop.f32.mrb[2].mxu0 }
 0x129   :  { %v408_v54 = vpop.f32.mrb[3].mxu0 }
 0x12a   :  { %v444_v55 = vpop.f32.mrb[0].mxu1 }
 0x12b   :  { %v446_v56 = vpop.f32.mrb[1].mxu1 }
 0x12c   :  { %v448_v57 = vpop.f32.mrb[2].mxu1 }
 0x12d   :  { %v449_v58 = vpop.f32.mrb[3].mxu1 }
 0x13b   :  { %v495_v3 = vpop.permute.xlu0 %494 }
 0x13c   :  { %v497_v10 = vmul.f32 %v495_v3, %v403_v51  ;;  %v499_v11 = vmul.f32 %v495_v3, %v444_v55  ;;  %v500_v12 = vmul.f32 %v495_v3, %v446_v56  ;;  %v498_v18 = vmul.f32 %v495_v3, %v405_v52 }
 0x13e   :  { %v531_v22 = vmul.f32 %v515_v7, %v499_v11  ;;  %v532_v23 = vmul.f32 %v519_v13, %v500_v12  ;;  %v529_v24 = vmul.f32 %v507_v9, %v497_v10  ;;  %v530_v26 = vmul.f32 %v511_v19, %v498_v18 }
 0x140   :  { %v594_v29 = vmax.f32 %v531_v22, %v532_v23 }
 0x166   :  { %v485_v14 = vpop.f32.mrb[4].mxu0 }
 0x167   :  { %v501_v15 = vmul.f32 %v495_v3, %v485_v14  ;;  %v757_v16 = vpop.f32.mrb[5].mxu0 }
 0x168   :  { %v488_v17 = vpop.f32.mrb[6].mxu0 }
 0x169   :  { %v533_v20 = vmul.f32 %v523_v8, %v501_v15  ;;  %v758_v21 = vpop.f32.mrb[7].mxu0  ;;  %v599_v15 = vld [vmem:[#allocation4] sm:$0xff] }
 0x16b   :  { %v556_v25 = vsel %vm551_vm2, %v533_v20, -1e+30 }
 0x16c   :  { %v592_v27 = vmax.f32 %v529_v24, %v556_v25 }
 0x16e   :  { %v593_v28 = vmax.f32 %v592_v27, %v530_v26 }
 0x170   :  { %v595_v30 = vmax.f32 %v593_v28, %v594_v29 }
 0x172   :  { %596 = vmax.xlane.f32.xlu1 %v595_v30 }
 0x1ff   :  { %v597_v32 = vpop.xlane.xlu1 %596 }
 0x200   :  { %v598_v33 = vmax.f32 %v591_v31, %v597_v32 }
 0x202   :  { %v600_v34 = vsub.f32 %v591_v31, %v598_v33  ;;  %632 = vst.msk [vmem:[#allocation3] sm:$0xff] %vm43_vm0, %v598_v33  ;;  %606 = vperm.xlu1 %767, %v598_v33  }
 0x204   :  { %v601_v11 = vmul.f32 1.442695, %v600_v34 }
 0x206   :  { %559 = vperm.xlu1 %767, %v557_v35  }
 0x281   :  { %v607_v36 = vpop.permute.xlu1 %606 }
 0x282   :  { %v609_v39 = vsub.f32 %v529_v24, %v607_v36  ;;  %v610_v40 = vsub.f32 %v530_v26, %v607_v36  ;;  %v611_v41 = vsub.f32 %v531_v22, %v607_v36  ;;  %v612_v42 = vsub.f32 %v532_v23, %v607_v36 }
 0x283   :  { %v613_v44 = vsub.f32 %v556_v25, %v607_v36 }
 0x284   :  { %v614_v45 = vmul.f32 1.442695, %v609_v39  ;;  %v616_v46 = vmul.f32 1.442695, %v610_v40  ;;  %v618_v47 = vmul.f32 1.442695, %v611_v41 }
 0x285   :  { %v620_v48 = vmul.f32 1.442695, %v612_v42  ;;  %v560_v49 = vpop.permute.xlu1 %559  ;;  %v622_v52 = vmul.f32 1.442695, %v613_v44 }
 0x286   :  { %810 = vpow2.f32 %v614_v45  ;;  %vm561_vm3 = vcmp.eq.s32.totalorder %v920_v61, %v560_v49  ;;  %vm562_vm4 = vcmp.eq.s32.totalorder %v536_v37, %v560_v49  ;;  %vm563_vm5 = vcmp.eq.s32.totalorder %v537_v38, %v560_v49 }
 0x287   :  { %812 = vpow2.f32 %v616_v46  ;;  %v689_v50 = vsel %vm561_vm3, 1.0, %v851_v5  ;;  %v690_v51 = vsel %vm562_vm4, 1.0, %v851_v5  ;;  %vm564_vm6 = vcmp.eq.s32.totalorder %v538_v43, %v560_v49 }
 0x288   :  { %v691_v53 = vsel %vm563_vm5, 1.0, %v851_v5  ;;  %814 = vpow2.f32 %v618_v47  ;;  %vm565_vm7 = vcmp.eq.s32.totalorder %v926_v4, %v560_v49  ;;  %v577_v54 = vmul.f32 %v689_v50, %v529_v24 }
 0x289   :  { %v578_v55 = vmul.f32 %v690_v51, %v530_v26  ;;  %v692_v56 = vsel %vm564_vm6, 1.0, %v851_v5  ;;  %816 = vpow2.f32 %v620_v48  ;;  %v579_v57 = vmul.f32 %v691_v53, %v531_v22  ;;  %v636_v22 = vld [vmem:[#allocation3] sm:$0xff] }
 0x28a   :  { %v693_v59 = vsel %vm565_vm7, 1.0, %v851_v5  ;;  %818 = vpow2.f32 %v622_v52  ;;  %v580_v60 = vmul.f32 %v692_v56, %v532_v23  ;;  %v576_v5 = vld [vmem:[#allocation5] sm:$0xff] }
 0x28b   :  { %v582_v58 = vadd.f32 %v578_v55, %v577_v54  ;;  %v581_v62 = vmul.f32 %v693_v59, %v556_v25  ;;  %820 = vpow2.f32 %v601_v11 }
 0x28d   :  { %v583_v61 = vadd.f32 %v582_v58, %v579_v57 }
 0x28f   :  { %v584_v63 = vadd.f32 %v583_v61, %v580_v60 }
 0x290   :  { %v811_v0 = vpop.eup %810 }
 0x291   :  { %v813_v1 = vpop.eup %812  ;;  %v585_v2 = vadd.f32 %v584_v63, %v581_v62 }
 0x292   :  { %v624_v3 = vadd.f32 %v813_v1, %v811_v0  ;;  %v815_v6 = vpop.eup %814 }
 0x293   :  { %586 = vadd.xlane.f32.xlu0 %v585_v2  ;;  %v817_v7 = vpop.eup %816 }
 0x294   :  { %v625_v4 = vadd.f32 %v815_v6, %v624_v3  ;;  %v819_v9 = vpop.eup %818 }
 0x295   :  { %v821_v14 = vpop.eup %820 }
 0x296   :  { %v626_v8 = vadd.f32 %v817_v7, %v625_v4  ;;  %v603_v16 = vmul.f32 %v821_v14, %v599_v15 }
 0x298   :  { %v627_v10 = vadd.f32 %v819_v9, %v626_v8 }
 0x29a   :  { %628 = vadd.xlane.f32.xlu1 %v627_v10 }
 0x320   :  { %v587_v12 = vpop.xlane.xlu0 %586 }
 0x321   :  { %v588_v13 = vadd.f32 %v587_v12, %v576_v5 }
 0x323   :  { %590 = vst.msk [vmem:[#allocation5] sm:$0xff] %vm43_vm0, %v588_v13 }
 0x327   :  { %v629_v17 = vpop.xlane.xlu1 %628 }
 0x328   :  { %v630_v18 = vadd.f32 %v629_v17, %v603_v16 }
 0x32a   :  { %631 = vst.msk [vmem:[#allocation4] sm:$0xff] %vm43_vm0, %v630_v18  ;;  %v641_v24 = vld [vmem:[#allocation5] sm:$0xff] }
 0x331   :  { %v637_v19 = vld [vmem:[#allocation4] sm:$0xff] }
 0x332   :  { %822 = vlog2.f32 %v637_v19 }
 0x33c   :  { %v823_v20 = vpop.eup %822 }
 0x33d   :  { %v639_v21 = vmul.f32 0.6931472, %v823_v20 }
 0x33f   :  { %v640_v23 = vadd.f32 %v639_v21, %v636_v22 }
 0x341   :  { %v642_v25 = vsub.f32 %v640_v23, %v641_v24 }
 0x343   :  { %643 = vst.msk [vmem:[%s953_s4] sm:$0xff] %vm43_vm0, %v642_v25 }
 0x344   :  { %648 = vsyncpa [#allocation7], 1 }

</bundles_post_ra>
